<compile_context>
chip_gen: v7x
topology: tpu7x:2x2x1
jax: 0.10.0
libtpu: 0.0.40
codegen_flags: <defaults>
</compile_context>

<pallas_src>
import functools

import jax
import jax.numpy as jnp
from jax.experimental import pallas as pl
from jax.experimental.pallas import tpu as pltpu

VOCAB = 81    # nn.Embedding(81, ...)
V_PAD = 128   # vocab padded to one full 128-lane vreg span (rows 81..127 are zero)


def _embed_kernel(idx_ref, table_ref, out_ref, *, s_tile, d):
    """One grid step: all B batch rows x S_TILE sequence positions.

    idx_ref:   (1, B, S_TILE) int32  -- this step's index block (streamed)
    table_ref: (V_PAD, D)     f32    -- resident across the whole grid
    out_ref:   (B, S_TILE*D)  f32    -- lane-dense flattened output block
    """
    idx_blk = idx_ref[0]                  # (B, S_TILE)
    table = table_ref[...]                # (V_PAD, D), hoisted out of the loop
    b = idx_blk.shape[0]
    # Hoisted once per step (JAX does not CSE broadcast_in_dim).
    vocab = jax.lax.broadcasted_iota(jnp.int32, (b, V_PAD), 1)

    # Static unroll over positions inside this tile. Each position is a
    # one-hot (B, 128) x (128, D) MXU matmul whose result lands at the right
    # lane offset of the flattened (B, S_TILE*D) block -> the HBM layout is
    # exactly torch.flatten(emb, start_dim=1); no wrapper reshape needed.
    for s in range(s_tile):
        onehot = (idx_blk[:, s:s + 1] == vocab).astype(table.dtype)   # exact 0/1
        emb = jnp.dot(onehot, table, preferred_element_type=jnp.float32)
        out_ref[:, s * d:(s + 1) * d] = emb.astype(out_ref.dtype)


def _choose_s_tile(S, D, B, *, max_unroll=32, max_block_bytes=4 << 20):
    """Largest divisor of S whose output block stays lane-dense and modest.

    Valid tiles either make S_TILE*D a multiple of 128 (dense vst / dense DMA)
    or equal S (block == full dim is always legal). Prefer the biggest tile
    within the unroll / VMEM-block budget to amortize the ~0.35us grid-step
    overhead (item 9); fall back to the smallest legal tile otherwise.
    """
    valid = [t for t in range(1, S + 1)
             if S % t == 0 and (t == S or (t * D) % 128 == 0)]
    preferred = [t for t in valid
                 if t <= max_unroll and B * t * D * 4 <= max_block_bytes]
    return max(preferred) if preferred else min(valid)


def embedd_forward(x_idx, table, *, out_dtype=jnp.float32):
    """Pallas equivalent of embedd.forward.

    x_idx: (B, S) integer indices (any int dtype; cast like torch's .to(int64))
    table: (81, D) float32 embedding weights (row 0 is the zero padding row)
    returns: (B, S*D) in out_dtype (default float32, matching torch)
    """
    x_idx = jnp.asarray(x_idx).astype(jnp.int32)
    B, S = x_idx.shape
    V, D = table.shape

    # Zero-pad the vocab axis to 128 (aligned K for the MXU, one-lane-span
    # one-hot). Pad rows are zero, so results are unchanged.
    table_p = jnp.zeros((V_PAD, D), dtype=table.dtype).at[:V, :].set(table)

    s_tile = _choose_s_tile(S, D, B)
    n_tiles = S // s_tile

    # (B, S) -> (n_tiles, B, s_tile): one index block per grid step. The index
    # array is tiny (B*S int32), so this wrapper-side shuffle is negligible,
    # and it keeps the index BlockSpec's last two dims equal to full dims.
    idx3 = x_idx.reshape(B, n_tiles, s_tile).transpose(1, 0, 2)

    kernel = functools.partial(_embed_kernel, s_tile=s_tile, d=D)

    out = pl.pallas_call(
        kernel,
        out_shape=jax.ShapeDtypeStruct((B, S * D), out_dtype),
        grid=(n_tiles,),
        in_specs=[
            # Streamed per-step index block.
            pl.BlockSpec((1, B, s_tile), lambda j: (j, 0, 0)),
            # Embedding table: constant block index -> VMEM-resident across grid.
            pl.BlockSpec((V_PAD, D), lambda j: (0, 0)),
        ],
        # Lane-dense output block: last dim s_tile*D is a multiple of 128
        # (or the full S*D), written straight into the flattened layout.
        out_specs=pl.BlockSpec((B, s_tile * D), lambda j: (0, j)),
        compiler_params=pltpu.CompilerParams(
            # Token tiles are independent -> shard across TensorCores on v7x;
            # harmless on single-TC v5e/v6e.
            dimension_semantics=("parallel",),
        ),
        cost_estimate=pl.CostEstimate(
            flops=2 * B * S * V_PAD * D,
            transcendentals=0,
            bytes_accessed=(B * S * 4) + (V_PAD * D * 4) + (B * S * D * 4),
        ),
    )(idx3, table_p)

    return out  # already (B, S*D) == torch.flatten(embedding(x), start_dim=1)


def make_embedding_table(key, embedding_dim, vocab=VOCAB, padding_idx=0):
    # Deterministic synthetic init (PyTorch nn.Embedding uses N(0,1) by default).
    table = jax.random.normal(key, (vocab, embedding_dim), dtype=jnp.float32)
    table = table.at[padding_idx].set(0.0)  # padding_idx row is zeros
    return table


if __name__ == "__main__":
    key = jax.random.PRNGKey(0)
    k_table, k_idx = jax.random.split(key)

    B, S, D = 2, 8, 32  # batch=2, seq=8, embedding_dim=32

    table = make_embedding_table(k_table, embedding_dim=D)

    # Random indices in [0, 81), force a couple of padding (0) entries.
    x_idx = jax.random.randint(k_idx, (B, S), 0, 81, dtype=jnp.int32)
    x_idx = x_idx.at[0, 0].set(0)
    x_idx = x_idx.at[1, 3].set(0)

    out = embedd_forward(x_idx, table)
    out = jax.block_until_ready(out)

    # Sanity check against a pure-JAX reference (table[idx] then flatten).
    ref = table[x_idx].reshape(B, S * D)
    assert out.shape == (B, S * D)
    assert jnp.allclose(out, ref, atol=1e-5), "mismatch vs reference gather"
    # padding rows must be exactly zero
    assert jnp.all(out[0, 0:D] == 0.0)

    print("KERNEL_OK")
</pallas_src>

<mosaic_0001>
module attributes {stable_mosaic.version = 11 : i64} {
  func.func @_embed_kernel(%arg0: i32, %arg1: memref<1x2x8xi32, #tpu.memory_space<vmem>>, %arg2: memref<128x32xf32, #tpu.memory_space<vmem>>, %arg3: memref<2x256xf32, #tpu.memory_space<vmem>>) attributes {dimension_semantics = [#tpu.dimension_semantics<parallel>], iteration_bounds = array<i64: 1>, scalar_prefetch = 0 : i64, scratch_operands = 0 : i64, tpu.core_type = #tpu.core_type<tc>, window_params = [{transform_indices = @transform_0, window_bounds = array<i64: 1, 2, 8>}, {pipeline_mode = #tpu.pipeline_mode<synchronous>, transform_indices = @transform_1, window_bounds = array<i64: 128, 32>}, {transform_indices = @transform_2, window_bounds = array<i64: 2, 256>}]} {
    %c0 = arith.constant 0 : index
    %c0_0 = arith.constant 0 : index
    %c0_1 = arith.constant 0 : index
    %0 = vector.load %arg1[%c0, %c0_0, %c0_1] : memref<1x2x8xi32, #tpu.memory_space<vmem>>, vector<1x2x8xi32>
    %1 = vector.shape_cast %0 : vector<1x2x8xi32> to vector<2x8xi32>
    %c0_2 = arith.constant 0 : index
    %c0_3 = arith.constant 0 : index
    %2 = vector.load %arg2[%c0_2, %c0_3] : memref<128x32xf32, #tpu.memory_space<vmem>>, vector<128x32xf32>
    %3 = tpu.iota {dimensions = array<i32: 1>} : vector<2x128xi32>
    %4 = vector.extract_strided_slice %1 {offsets = [0, 0], sizes = [2, 1], strides = [1, 1]} : vector<2x8xi32> to vector<2x1xi32>
    %5 = vector.broadcast %4 : vector<2x1xi32> to vector<2x128xi32>
    %6 = arith.cmpi eq, %5, %3 : vector<2x128xi32>
    %7 = arith.extui %6 : vector<2x128xi1> to vector<2x128xi32>
    %8 = arith.sitofp %7 : vector<2x128xi32> to vector<2x128xf32>
    %cst = arith.constant dense<0.000000e+00> : vector<2x32xf32>
    %9 = tpu.matmul %8, %2, %cst {dimension_numbers = #tpu.dot_dimension_numbers<[1], [0], [0], [1], [0, 0, 1, 1], [], []>} : vector<2x128xf32>, vector<128x32xf32>, vector<2x32xf32> -> vector<2x32xf32>
    %c0_4 = arith.constant 0 : index
    %c0_5 = arith.constant 0 : index
    %10 = vector.load %arg3[%c0_4, %c0_5] : memref<2x256xf32, #tpu.memory_space<vmem>>, vector<2x32xf32>
    tpu.vector_store %arg3[%c0_4, %c0_5], %9 {strides = array<i32>} : memref<2x256xf32, #tpu.memory_space<vmem>>, vector<2x32xf32>,
    %11 = vector.extract_strided_slice %1 {offsets = [0, 1], sizes = [2, 1], strides = [1, 1]} : vector<2x8xi32> to vector<2x1xi32>
    %12 = vector.broadcast %11 : vector<2x1xi32> to vector<2x128xi32>
    %13 = arith.cmpi eq, %12, %3 : vector<2x128xi32>
    %14 = arith.extui %13 : vector<2x128xi1> to vector<2x128xi32>
    %15 = arith.sitofp %14 : vector<2x128xi32> to vector<2x128xf32>
    %cst_6 = arith.constant dense<0.000000e+00> : vector<2x32xf32>
    %16 = tpu.matmul %15, %2, %cst_6 {dimension_numbers = #tpu.dot_dimension_numbers<[1], [0], [0], [1], [0, 0, 1, 1], [], []>} : vector<2x128xf32>, vector<128x32xf32>, vector<2x32xf32> -> vector<2x32xf32>
    %c0_7 = arith.constant 0 : index
    %c32 = arith.constant 32 : index
    %17 = vector.load %arg3[%c0_7, %c32] : memref<2x256xf32, #tpu.memory_space<vmem>>, vector<2x32xf32>
    tpu.vector_store %arg3[%c0_7, %c32], %16 {strides = array<i32>} : memref<2x256xf32, #tpu.memory_space<vmem>>, vector<2x32xf32>,
    %18 = vector.extract_strided_slice %1 {offsets = [0, 2], sizes = [2, 1], strides = [1, 1]} : vector<2x8xi32> to vector<2x1xi32>
    %19 = vector.broadcast %18 : vector<2x1xi32> to vector<2x128xi32>
    %20 = arith.cmpi eq, %19, %3 : vector<2x128xi32>
    %21 = arith.extui %20 : vector<2x128xi1> to vector<2x128xi32>
    %22 = arith.sitofp %21 : vector<2x128xi32> to vector<2x128xf32>
    %cst_8 = arith.constant dense<0.000000e+00> : vector<2x32xf32>
    %23 = tpu.matmul %22, %2, %cst_8 {dimension_numbers = #tpu.dot_dimension_numbers<[1], [0], [0], [1], [0, 0, 1, 1], [], []>} : vector<2x128xf32>, vector<128x32xf32>, vector<2x32xf32> -> vector<2x32xf32>
    %c0_9 = arith.constant 0 : index
    %c64 = arith.constant 64 : index
    %24 = vector.load %arg3[%c0_9, %c64] : memref<2x256xf32, #tpu.memory_space<vmem>>, vector<2x32xf32>
    tpu.vector_store %arg3[%c0_9, %c64], %23 {strides = array<i32>} : memref<2x256xf32, #tpu.memory_space<vmem>>, vector<2x32xf32>,
    %25 = vector.extract_strided_slice %1 {offsets = [0, 3], sizes = [2, 1], strides = [1, 1]} : vector<2x8xi32> to vector<2x1xi32>
    %26 = vector.broadcast %25 : vector<2x1xi32> to vector<2x128xi32>
    %27 = arith.cmpi eq, %26, %3 : vector<2x128xi32>
    %28 = arith.extui %27 : vector<2x128xi1> to vector<2x128xi32>
    %29 = arith.sitofp %28 : vector<2x128xi32> to vector<2x128xf32>
    %cst_10 = arith.constant dense<0.000000e+00> : vector<2x32xf32>
    %30 = tpu.matmul %29, %2, %cst_10 {dimension_numbers = #tpu.dot_dimension_numbers<[1], [0], [0], [1], [0, 0, 1, 1], [], []>} : vector<2x128xf32>, vector<128x32xf32>, vector<2x32xf32> -> vector<2x32xf32>
    %c0_11 = arith.constant 0 : index
    %c96 = arith.constant 96 : index
    %31 = vector.load %arg3[%c0_11, %c96] : memref<2x256xf32, #tpu.memory_space<vmem>>, vector<2x32xf32>
    tpu.vector_store %arg3[%c0_11, %c96], %30 {strides = array<i32>} : memref<2x256xf32, #tpu.memory_space<vmem>>, vector<2x32xf32>,
    %32 = vector.extract_strided_slice %1 {offsets = [0, 4], sizes = [2, 1], strides = [1, 1]} : vector<2x8xi32> to vector<2x1xi32>
    %33 = vector.broadcast %32 : vector<2x1xi32> to vector<2x128xi32>
    %34 = arith.cmpi eq, %33, %3 : vector<2x128xi32>
    %35 = arith.extui %34 : vector<2x128xi1> to vector<2x128xi32>
    %36 = arith.sitofp %35 : vector<2x128xi32> to vector<2x128xf32>
    %cst_12 = arith.constant dense<0.000000e+00> : vector<2x32xf32>
    %37 = tpu.matmul %36, %2, %cst_12 {dimension_numbers = #tpu.dot_dimension_numbers<[1], [0], [0], [1], [0, 0, 1, 1], [], []>} : vector<2x128xf32>, vector<128x32xf32>, vector<2x32xf32> -> vector<2x32xf32>
    %c0_13 = arith.constant 0 : index
    %c128 = arith.constant 128 : index
    %38 = vector.load %arg3[%c0_13, %c128] : memref<2x256xf32, #tpu.memory_space<vmem>>, vector<2x32xf32>
    tpu.vector_store %arg3[%c0_13, %c128], %37 {strides = array<i32>} : memref<2x256xf32, #tpu.memory_space<vmem>>, vector<2x32xf32>,
    %39 = vector.extract_strided_slice %1 {offsets = [0, 5], sizes = [2, 1], strides = [1, 1]} : vector<2x8xi32> to vector<2x1xi32>
    %40 = vector.broadcast %39 : vector<2x1xi32> to vector<2x128xi32>
    %41 = arith.cmpi eq, %40, %3 : vector<2x128xi32>
    %42 = arith.extui %41 : vector<2x128xi1> to vector<2x128xi32>
    %43 = arith.sitofp %42 : vector<2x128xi32> to vector<2x128xf32>
    %cst_14 = arith.constant dense<0.000000e+00> : vector<2x32xf32>
    %44 = tpu.matmul %43, %2, %cst_14 {dimension_numbers = #tpu.dot_dimension_numbers<[1], [0], [0], [1], [0, 0, 1, 1], [], []>} : vector<2x128xf32>, vector<128x32xf32>, vector<2x32xf32> -> vector<2x32xf32>
    %c0_15 = arith.constant 0 : index
    %c160 = arith.constant 160 : index
    %45 = vector.load %arg3[%c0_15, %c160] : memref<2x256xf32, #tpu.memory_space<vmem>>, vector<2x32xf32>
    tpu.vector_store %arg3[%c0_15, %c160], %44 {strides = array<i32>} : memref<2x256xf32, #tpu.memory_space<vmem>>, vector<2x32xf32>,
    %46 = vector.extract_strided_slice %1 {offsets = [0, 6], sizes = [2, 1], strides = [1, 1]} : vector<2x8xi32> to vector<2x1xi32>
    %47 = vector.broadcast %46 : vector<2x1xi32> to vector<2x128xi32>
    %48 = arith.cmpi eq, %47, %3 : vector<2x128xi32>
    %49 = arith.extui %48 : vector<2x128xi1> to vector<2x128xi32>
    %50 = arith.sitofp %49 : vector<2x128xi32> to vector<2x128xf32>
    %cst_16 = arith.constant dense<0.000000e+00> : vector<2x32xf32>
    %51 = tpu.matmul %50, %2, %cst_16 {dimension_numbers = #tpu.dot_dimension_numbers<[1], [0], [0], [1], [0, 0, 1, 1], [], []>} : vector<2x128xf32>, vector<128x32xf32>, vector<2x32xf32> -> vector<2x32xf32>
    %c0_17 = arith.constant 0 : index
    %c192 = arith.constant 192 : index
    %52 = vector.load %arg3[%c0_17, %c192] : memref<2x256xf32, #tpu.memory_space<vmem>>, vector<2x32xf32>
    tpu.vector_store %arg3[%c0_17, %c192], %51 {strides = array<i32>} : memref<2x256xf32, #tpu.memory_space<vmem>>, vector<2x32xf32>,
    %53 = vector.extract_strided_slice %1 {offsets = [0, 7], sizes = [2, 1], strides = [1, 1]} : vector<2x8xi32> to vector<2x1xi32>
    %54 = vector.broadcast %53 : vector<2x1xi32> to vector<2x128xi32>
    %55 = arith.cmpi eq, %54, %3 : vector<2x128xi32>
    %56 = arith.extui %55 : vector<2x128xi1> to vector<2x128xi32>
    %57 = arith.sitofp %56 : vector<2x128xi32> to vector<2x128xf32>
    %cst_18 = arith.constant dense<0.000000e+00> : vector<2x32xf32>
    %58 = tpu.matmul %57, %2, %cst_18 {dimension_numbers = #tpu.dot_dimension_numbers<[1], [0], [0], [1], [0, 0, 1, 1], [], []>} : vector<2x128xf32>, vector<128x32xf32>, vector<2x32xf32> -> vector<2x32xf32>
    %c0_19 = arith.constant 0 : index
    %c224 = arith.constant 224 : index
    %59 = vector.load %arg3[%c0_19, %c224] : memref<2x256xf32, #tpu.memory_space<vmem>>, vector<2x32xf32>
    tpu.vector_store %arg3[%c0_19, %c224], %58 {strides = array<i32>} : memref<2x256xf32, #tpu.memory_space<vmem>>, vector<2x32xf32>,
    return
  }
  func.func @transform_0(%arg0: i32) -> (i32, i32, i32) {
    %c0_i32 = arith.constant 0 : i32
    %c0_i32_0 = arith.constant 0 : i32
    %c0_i32_1 = arith.constant 0 : i32
    return %arg0, %c0_i32, %c0_i32_0 : i32, i32, i32
  }
  func.func @transform_1(%arg0: i32) -> (i32, i32) {
    %c0_i32 = arith.constant 0 : i32
    %c0_i32_0 = arith.constant 0 : i32
    %c0_i32_1 = arith.constant 0 : i32
    return %c0_i32, %c0_i32_0 : i32, i32
  }
  func.func @transform_2(%arg0: i32) -> (i32, i32) {
    %c0_i32 = arith.constant 0 : i32
    %c0_i32_0 = arith.constant 0 : i32
    return %c0_i32, %arg0 : i32, i32
  }
}

</mosaic_0001>

<bundles_post_ra>
// kernel: tpu_custom_call.1
= control target key start
LH: loop header
LB: loop body
LE: loop exit
PB: predicated region body
PF: predicated region fallthrough
CT: control target
= control target key end

     0   :  { %v1405_v1 = vmov 0   ;;  %v1406_v2 = vmov 2   ;;  %v1407_v8 = vmov 0.0|0.0   ;;  %v1408_v10 = vmov 1   ;;  %s1692_s0 = inlined_call_operand.vmem [shape: s32[1,2,8], index: 0, kind: input, shape index: {}]   ;;  %s1693_s1 = inlined_call_operand.vmem [shape: f32[128,32], index: 1, kind: input, shape index: {}]   ;;  %s1694_s2 = inlined_call_operand.hbm [shape: f32[2,256], index: 2, kind: output, shape index: {}]  }
   0x1   :  { %v1440_v0 = vld [vmem:[%s1692_s0] sm:$0x3]  ;;  %1372 = vset.pattern.permute.xlu0 %v1405_v1  ;;  %1374 = vset.pattern.permute.xlu1 %v1406_v2  ;;  %v14_v4 = vld [vmem:[%s1693_s1 + $0x8] sm:$0xff]  ;;  %v15_v6 = vld [vmem:[%s1693_s1 + $0x10] sm:$0xff]  ;;  %v1409_v11 = vmov 3  }
   0x2   :  { %v13_v3 = vld [vmem:[%s1693_s1] sm:$0xff]  ;;  %32 = vperm.xlu0 %1372, %v1440_v0   ;;  %199 = vperm.xlu1 %1374, %v1440_v0   ;;  %v16_v7 = vld [vmem:[%s1693_s1 + $0x18] sm:$0xff]  ;;  %v18_v13 = vld [vmem:[%s1693_s1 + $0x28] sm:$0xff] }
   0x3   :  { %v1450_v5 = vpack.c.bf16 %v14_v4, %v13_v3  ;;  %1163 = vmatprep.subr.bf16.mxu0 %v1407_v8  ;;  %1187 = vmatprep.subr.bf16.mxu1 %v1407_v8  ;;  %v1461_v9 = vpack.c.bf16 %v16_v7, %v15_v6  ;;  %v17_v12 = vld [vmem:[%s1693_s1 + $0x20] sm:$0xff] }
   0x5   :  { %1165 = vmatpush3.bf16.msra.mxu0 %v1450_v5  ;;  %1189 = vmatpush3.bf16.msra.mxu1 %v1450_v5 }
   0x6   :  { %1166 = vmatprep.subr.bf16.mxu0 %v1407_v8  ;;  %1190 = vmatprep.subr.bf16.mxu1 %v1407_v8 }
   0x7   :  { %1373 = vset.pattern.permute.xlu0 %v1408_v10  ;;  %1375 = vset.pattern.permute.xlu1 %v1409_v11 }
   0x8   :  { %7 = vsyncpa [#allocation3], 0  ;;  %110 = vperm.xlu0 %1373, %v1440_v0   ;;  %288 = vperm.xlu1 %1375, %v1440_v0   ;;  %v1477_v14 = vpack.c.bf16 %v18_v13, %v17_v12  ;;  %v19_v15 = vld [vmem:[%s1693_s1 + $0x30] sm:$0xff]  ;;  %v20_v16 = vld [vmem:[%s1693_s1 + $0x38] sm:$0xff]  ;;  %vm1410_vm0 = vmmov 0   ;;  %v1411_v17 = vmov 0.0   ;;  %v29_v35 = vlaneseq }
   0x9   :  { %1168 = vmatpush3.bf16.msra.mxu0 %v1461_v9  ;;  %1192 = vmatpush3.bf16.msra.mxu1 %v1461_v9  ;;  %v1412_v18 = vmov 4   ;;  %v1413_v19 = vmov 5   ;;  %v1493_v20 = vpack.c.bf16 %v20_v16, %v19_v15  ;;  %v21_v21 = vld [vmem:[%s1693_s1 + $0x40] sm:$0xff]  ;;  %v22_v22 = vld [vmem:[%s1693_s1 + $0x48] sm:$0xff]  ;;  %v1414_v23 = vmov 6   ;;  %v23_v26 = vld [vmem:[%s1693_s1 + $0x50] sm:$0xff] }
   0xa   :  { %1169 = vmatprep.subr.bf16.mxu0 %v1407_v8  ;;  %1193 = vmatprep.subr.bf16.mxu1 %v1407_v8  ;;  %v1415_v24 = vmov 7   ;;  %v1506_v25 = vpack.c.bf16 %v22_v22, %v21_v21  ;;  %v24_v27 = vld [vmem:[%s1693_s1 + $0x58] sm:$0xff]  ;;  %v25_v29 = vld [vmem:[%s1693_s1 + $0x60] sm:$0xff]  ;;  %v26_v30 = vld [vmem:[%s1693_s1 + $0x68] sm:$0xff]  ;;  %v1553_v36 = vand.u32 127, %v29_v35  ;;  %v1416_v38 = vmov 1.0  }
   0xb   :  { %915 = vmatprep.mubr.msk.f32.mxu0 %vm1410_vm0, %v1411_v17  ;;  %950 = vmatprep.mubr.msk.f32.mxu1 %vm1410_vm0, %v1411_v17  ;;  %v1518_v28 = vpack.c.bf16 %v24_v27, %v23_v26  ;;  %v1531_v31 = vpack.c.bf16 %v26_v30, %v25_v29  ;;  %v27_v32 = vld [vmem:[%s1693_s1 + $0x70] sm:$0xff]  ;;  %v28_v33 = vld [vmem:[%s1693_s1 + $0x78] sm:$0xff]  ;;  %v1417_v46 = vmov 1983009808   ;;  %vm107_vm9 = vcmask 254976   ;;  %s1418_s1 = smov 32  }
   0xc   :  { %1376 = vset.pattern.permute.xlu1 %v1412_v18  ;;  %1377 = vset.pattern.permute.xlu0 %v1413_v19  ;;  %v1543_v34 = vpack.c.bf16 %v28_v33, %v27_v32  ;;  %v187_v47 = vunpack.c.l.s4 %v1417_v46  ;;  %v190_v49 = vshrl.u32 %v29_v35, 7  ;;  %s1419_s14 = smov 64   ;;  %s1420_s0 = smov 96   ;;  %vm196_vm10 = vcmask 517376  }
   0xd   :  { %377 = vperm.xlu1 %1376, %v1440_v0   ;;  %454 = vperm.xlu0 %1377, %v1440_v0   ;;  %vm285_vm11 = vcmask 779776   ;;  %vm374_vm12 = vcmask 1042176   ;;  %s1421_s15 = smov [#allocation2]  }
   0xe   :  { %1171 = vmatpush3.bf16.msra.mxu0 %v1477_v14  ;;  %1195 = vmatpush3.bf16.msra.mxu1 %v1477_v14  ;;  %v188_v48 = vunpack.c.0.s8 %v187_v47  ;;  %s723_s16 = sshll.u32 %s1421_s15, 4  ;;  %s724_s16 = int_to_ptr.vmem [resolvable:$true] %s723_s16 }
   0xf   :  { %1172 = vmatprep.subr.bf16.mxu0 %v1407_v8  ;;  %1196 = vmatprep.subr.bf16.mxu1 %v1407_v8  ;;  %s1381_s17 = scalar_lea.vmem %s724_s16, 64  ;;  %p1386_p1 = scmp.lt.s32.totalorder %s724_s16, %s724_s16 }
  0x10   :  { %v191_v52 = vsub.s32 %v188_v48, %v190_v49  ;;  %p1382_p0 = scmp.ne.s32.totalorder %s724_s16, %s1381_s17  ;;  %p1387_p2 = scmp.lt.s32.totalorder %s1381_s17, %s1381_s17 }
  0x11   :  { %1378 = vset.pattern.permute.xlu1 %v1414_v23  ;;  %1380 = vset.pattern.permute.xlu0 %v1415_v24 }
  0x12   :  { %542 = vperm.xlu1 %1378, %v1440_v0   ;;  %1174 = vmatpush3.bf16.msra.mxu0 %v1493_v20  ;;  %p1388_p3 = por %p1387_p2, %p1386_p1 }
  0x13   :  { %1175 = vmatprep.subr.bf16.mxu0 %v1407_v8  ;;  %1198 = vmatpush3.bf16.msra.mxu1 %v1493_v20 }
  0x14   :  { %1199 = vmatprep.subr.bf16.mxu1 %v1407_v8  ;;  %p1389_p4 = pnand %p1388_p3, %p1382_p0 }
  0x16   :  { %1379 = vset.pattern.permute.xlu1 %v1415_v24  ;;  %1177 = vmatpush3.bf16.msra.mxu0 %v1506_v25 }
  0x17   :  { %630 = vperm.xlu1 %1379, %v1440_v0   ;;  %1178 = vmatprep.subr.bf16.mxu0 %v1407_v8 }
  0x18   :  { %1201 = vmatpush3.bf16.msra.mxu1 %v1506_v25 }
  0x19   :  { %1202 = vmatprep.subr.bf16.mxu1 %v1407_v8 }
  0x1a   :  { %1180 = vmatpush3.bf16.msra.mxu0 %v1518_v28 }
  0x1b   :  { %1181 = vmatprep.subr.bf16.mxu0 %v1407_v8 }
  0x1c   :  { %1204 = vmatpush3.bf16.msra.mxu1 %v1518_v28 }
  0x1d   :  { %1205 = vmatprep.subr.bf16.mxu1 %v1407_v8 }
  0x1e   :  { %1183 = vmatpush3.bf16.msra.mxu0 %v1531_v31 }
  0x1f   :  { %1184 = vmatprep.subr.bf16.mxu0 %v1407_v8 }
  0x20   :  { %1207 = vmatpush3.bf16.msra.mxu1 %v1531_v31 }
  0x21   :  { %1208 = vmatprep.subr.bf16.mxu1 %v1407_v8 }
  0x22   :  { %1186 = vmatpush3.bf16.msra.mxu0 %v1543_v34 }
  0x23   :  { %1211 = vmatprep.subr.bf16.mxu0 %v1407_v8 }
  0x24   :  { %1210 = vmatpush3.bf16.msra.mxu1 %v1543_v34 }
  0x25   :  { %1235 = vmatprep.subr.bf16.mxu1 %v1407_v8 }
  0x81   :  { %v33_v37 = vpop.permute.xlu0 %32  ;;  %v200_v40 = vpop.permute.xlu1 %199 }
  0x82   :  { %vm34_vm1 = vcmp.eq.s32.totalorder %v33_v37, %v1553_v36  ;;  %vm201_vm3 = vcmp.eq.s32.totalorder %v200_v40, %v1553_v36 }
  0x83   :  { %916 = vmatmul.mubr.msk.f32.vlgmr.msra.gmra.mrb[0].mxu0 %vm34_vm1, %v1416_v38 }
  0x84   :  { %1213 = vmatpush3.bf16.msra.mxu0 %v1450_v5  ;;  %985 = vmatprep.mubr.msk.f32.mxu0 %vm1410_vm0, %v1411_v17 }
  0x85   :  { %1214 = vmatprep.subr.bf16.mxu0 %v1407_v8 }
  0x87   :  { %v111_v39 = vpop.permute.xlu0 %110  ;;  %v289_v41 = vpop.permute.xlu1 %288 }
  0x88   :  { %vm112_vm2 = vcmp.eq.s32.totalorder %v111_v39, %v1553_v36  ;;  %1216 = vmatpush3.bf16.msra.mxu0 %v1461_v9  ;;  %vm290_vm4 = vcmp.eq.s32.totalorder %v289_v41, %v1553_v36 }
  0x89   :  { %951 = vmatmul.mubr.msk.f32.vlgmr.msra.gmra.mrb[0].mxu1 %vm112_vm2, %v1416_v38  ;;  %1217 = vmatprep.subr.bf16.mxu0 %v1407_v8 }
  0x8a   :  { %1237 = vmatpush3.bf16.msra.mxu1 %v1450_v5  ;;  %1020 = vmatprep.mubr.msk.f32.mxu1 %vm1410_vm0, %v1411_v17 }
  0x8b   :  { %1238 = vmatprep.subr.bf16.mxu1 %v1407_v8 }
  0x8c   :  { %1219 = vmatpush3.bf16.msra.mxu0 %v1477_v14  ;;  %v378_v42 = vpop.permute.xlu1 %377  ;;  %v455_v43 = vpop.permute.xlu0 %454 }
  0x8d   :  { %1220 = vmatprep.subr.bf16.mxu0 %v1407_v8  ;;  %vm379_vm5 = vcmp.eq.s32.totalorder %v378_v42, %v1553_v36  ;;  %vm456_vm6 = vcmp.eq.s32.totalorder %v455_v43, %v1553_v36 }
  0x8e   :  { %1240 = vmatpush3.bf16.msra.mxu1 %v1461_v9 }
  0x8f   :  { %1241 = vmatprep.subr.bf16.mxu1 %v1407_v8 }
  0x90   :  { %1222 = vmatpush3.bf16.msra.mxu0 %v1493_v20 }
  0x91   :  { %1223 = vmatprep.subr.bf16.mxu0 %v1407_v8  ;;  %v543_v44 = vpop.permute.xlu1 %542 }
  0x92   :  { %1243 = vmatpush3.bf16.msra.mxu1 %v1477_v14  ;;  %vm544_vm7 = vcmp.eq.s32.totalorder %v543_v44, %v1553_v36 }
  0x93   :  { %1244 = vmatprep.subr.bf16.mxu1 %v1407_v8 }
  0x94   :  { %1225 = vmatpush3.bf16.msra.mxu0 %v1506_v25 }
  0x95   :  { %1226 = vmatprep.subr.bf16.mxu0 %v1407_v8 }
  0x96   :  { %1246 = vmatpush3.bf16.msra.mxu1 %v1493_v20  ;;  %v631_v45 = vpop.permute.xlu1 %630 }
  0x97   :  { %1247 = vmatprep.subr.bf16.mxu1 %v1407_v8  ;;  %vm632_vm8 = vcmp.eq.s32.totalorder %v631_v45, %v1553_v36 }
  0x98   :  { %1228 = vmatpush3.bf16.msra.mxu0 %v1518_v28 }
  0x99   :  { %1229 = vmatprep.subr.bf16.mxu0 %v1407_v8 }
  0x9a   :  { %1249 = vmatpush3.bf16.msra.mxu1 %v1506_v25 }
  0x9b   :  { %1250 = vmatprep.subr.bf16.mxu1 %v1407_v8 }
  0x9c   :  { %1231 = vmatpush3.bf16.msra.mxu0 %v1531_v31 }
  0x9d   :  { %1232 = vmatprep.subr.bf16.mxu0 %v1407_v8 }
  0x9e   :  { %1252 = vmatpush3.bf16.msra.mxu1 %v1518_v28 }
  0x9f   :  { %1253 = vmatprep.subr.bf16.mxu1 %v1407_v8 }
  0xa0   :  { %1234 = vmatpush3.bf16.msra.mxu0 %v1543_v34 }
  0xa1   :  { %1259 = vmatprep.subr.bf16.mxu0 %v1407_v8 }
  0xa2   :  { %1255 = vmatpush3.bf16.msra.mxu1 %v1531_v31 }
  0xa3   :  { %1256 = vmatprep.subr.bf16.mxu1 %v1407_v8  ;;  %986 = vmatmul.mubr.msk.f32.vlgmr.msra.gmra.mrb[2].mxu0 %vm201_vm3, %v1416_v38 }
  0xa4   :  { %1261 = vmatpush3.bf16.msra.mxu0 %v1450_v5  ;;  %1055 = vmatprep.mubr.msk.f32.mxu0 %vm1410_vm0, %v1411_v17 }
  0xa5   :  { %1262 = vmatprep.subr.bf16.mxu0 %v1407_v8 }
  0xa6   :  { %1258 = vmatpush3.bf16.msra.mxu1 %v1543_v34 }
  0xa7   :  { %1283 = vmatprep.subr.bf16.mxu1 %v1407_v8 }
  0xa8   :  { %1264 = vmatpush3.bf16.msra.mxu0 %v1461_v9 }
  0xa9   :  { %1021 = vmatmul.mubr.msk.f32.vlgmr.msra.gmra.mrb[2].mxu1 %vm290_vm4, %v1416_v38  ;;  %1265 = vmatprep.subr.bf16.mxu0 %v1407_v8 }
  0xaa   :  { %1285 = vmatpush3.bf16.msra.mxu1 %v1450_v5  ;;  %1090 = vmatprep.mubr.msk.f32.mxu1 %vm1410_vm0, %v1411_v17 }
  0xab   :  { %1286 = vmatprep.subr.bf16.mxu1 %v1407_v8 }
  0xac   :  { %1267 = vmatpush3.bf16.msra.mxu0 %v1477_v14 }
  0xad   :  { %1268 = vmatprep.subr.bf16.mxu0 %v1407_v8 }
  0xae   :  { %1288 = vmatpush3.bf16.msra.mxu1 %v1461_v9 }
  0xaf   :  { %1289 = vmatprep.subr.bf16.mxu1 %v1407_v8 }
  0xb0   :  { %1270 = vmatpush3.bf16.msra.mxu0 %v1493_v20 }
  0xb1   :  { %1271 = vmatprep.subr.bf16.mxu0 %v1407_v8 }
  0xb2   :  { %1291 = vmatpush3.bf16.msra.mxu1 %v1477_v14 }
  0xb3   :  { %1292 = vmatprep.subr.bf16.mxu1 %v1407_v8 }
  0xb4   :  { %1273 = vmatpush3.bf16.msra.mxu0 %v1506_v25 }
  0xb5   :  { %1274 = vmatprep.subr.bf16.mxu0 %v1407_v8 }
  0xb6   :  { %1294 = vmatpush3.bf16.msra.mxu1 %v1493_v20 }
  0xb7   :  { %1295 = vmatprep.subr.bf16.mxu1 %v1407_v8 }
  0xb8   :  { %1276 = vmatpush3.bf16.msra.mxu0 %v1518_v28 }
  0xb9   :  { %1277 = vmatprep.subr.bf16.mxu0 %v1407_v8 }
  0xba   :  { %1297 = vmatpush3.bf16.msra.mxu1 %v1506_v25 }
  0xbb   :  { %1298 = vmatprep.subr.bf16.mxu1 %v1407_v8 }
  0xbc   :  { %1279 = vmatpush3.bf16.msra.mxu0 %v1531_v31 }
  0xbd   :  { %1280 = vmatprep.subr.bf16.mxu0 %v1407_v8 }
  0xbe   :  { %1300 = vmatpush3.bf16.msra.mxu1 %v1518_v28 }
  0xbf   :  { %1301 = vmatprep.subr.bf16.mxu1 %v1407_v8 }
  0xc0   :  { %1282 = vmatpush3.bf16.msra.mxu0 %v1543_v34 }
  0xc1   :  { %1307 = vmatprep.subr.bf16.mxu0 %v1407_v8 }
  0xc2   :  { %1303 = vmatpush3.bf16.msra.mxu1 %v1531_v31 }
  0xc3   :  { %1304 = vmatprep.subr.bf16.mxu1 %v1407_v8  ;;  %1056 = vmatmul.mubr.msk.f32.vlgmr.msra.gmra.mrb[4].mxu0 %vm379_vm5, %v1416_v38 }
  0xc4   :  { %1309 = vmatpush3.bf16.msra.mxu0 %v1450_v5  ;;  %1125 = vmatprep.mubr.msk.f32.mxu0 %vm1410_vm0, %v1411_v17 }
  0xc5   :  { %1310 = vmatprep.subr.bf16.mxu0 %v1407_v8 }
  0xc6   :  { %1306 = vmatpush3.bf16.msra.mxu1 %v1543_v34 }
  0xc7   :  { %1331 = vmatprep.subr.bf16.mxu1 %v1407_v8 }
  0xc8   :  { %1312 = vmatpush3.bf16.msra.mxu0 %v1461_v9 }
  0xc9   :  { %1091 = vmatmul.mubr.msk.f32.vlgmr.msra.gmra.mrb[4].mxu1 %vm456_vm6, %v1416_v38  ;;  %1313 = vmatprep.subr.bf16.mxu0 %v1407_v8 }
  0xca   :  { %1333 = vmatpush3.bf16.msra.mxu1 %v1450_v5  ;;  %1160 = vmatprep.mubr.msk.f32.mxu1 %vm1410_vm0, %v1411_v17 }
  0xcb   :  { %1334 = vmatprep.subr.bf16.mxu1 %v1407_v8 }
  0xcc   :  { %1315 = vmatpush3.bf16.msra.mxu0 %v1477_v14 }
  0xcd   :  { %1316 = vmatprep.subr.bf16.mxu0 %v1407_v8 }
  0xce   :  { %1336 = vmatpush3.bf16.msra.mxu1 %v1461_v9 }
  0xcf   :  { %1337 = vmatprep.subr.bf16.mxu1 %v1407_v8 }
  0xd0   :  { %1318 = vmatpush3.bf16.msra.mxu0 %v1493_v20 }
  0xd1   :  { %1319 = vmatprep.subr.bf16.mxu0 %v1407_v8 }
  0xd2   :  { %1339 = vmatpush3.bf16.msra.mxu1 %v1477_v14 }
  0xd3   :  { %1340 = vmatprep.subr.bf16.mxu1 %v1407_v8 }
  0xd4   :  { %1321 = vmatpush3.bf16.msra.mxu0 %v1506_v25 }
  0xd5   :  { %1322 = vmatprep.subr.bf16.mxu0 %v1407_v8 }
  0xd6   :  { %1342 = vmatpush3.bf16.msra.mxu1 %v1493_v20 }
  0xd7   :  { %1343 = vmatprep.subr.bf16.mxu1 %v1407_v8 }
  0xd8   :  { %1324 = vmatpush3.bf16.msra.mxu0 %v1518_v28 }
  0xd9   :  { %1325 = vmatprep.subr.bf16.mxu0 %v1407_v8 }
  0xda   :  { %1345 = vmatpush3.bf16.msra.mxu1 %v1506_v25 }
  0xdb   :  { %1346 = vmatprep.subr.bf16.mxu1 %v1407_v8 }
  0xdc   :  { %1327 = vmatpush3.bf16.msra.mxu0 %v1531_v31 }
  0xdd   :  { %1328 = vmatprep.subr.bf16.mxu0 %v1407_v8 }
  0xde   :  { %1348 = vmatpush3.bf16.msra.mxu1 %v1518_v28 }
  0xdf   :  { %1349 = vmatprep.subr.bf16.mxu1 %v1407_v8 }
  0xe0   :  { %1330 = vmatpush3.bf16.msra.mxu0 %v1543_v34 }
  0xe2   :  { %1351 = vmatpush3.bf16.msra.mxu1 %v1531_v31 }
  0xe3   :  { %1352 = vmatprep.subr.bf16.mxu1 %v1407_v8  ;;  %1126 = vmatmul.mubr.msk.f32.vlgmr.msra.gmra.mrb[6].mxu0 %vm544_vm7, %v1416_v38 }
  0xe6   :  { %1354 = vmatpush3.bf16.msra.mxu1 %v1543_v34 }
  0xe9   :  { %1161 = vmatmul.mubr.msk.f32.vlgmr.msra.gmra.mrb[6].mxu1 %vm632_vm8, %v1416_v38 }
 0x156   :  { %v103_v50 = vpop.f32.mrb[0].mxu0 }
 0x157   :  { %108 = vst.msk [vmem:[#allocation2] sm:$0x3] %vm107_vm9, %v103_v50  ;;  %v917_v51 = vpop.f32.mrb[1].mxu0 }
 0x15c   :  { %v181_v53 = vpop.f32.mrb[0].mxu1 }
 0x15d   :  { %v192_v54 = vrot.slane %v181_v53, %v191_v52  ;;  %v952_v55 = vpop.f32.mrb[1].mxu1 }
 0x15f   :  { %193 = vrot.lane.b32.xlu0 %v192_v54, %s1418_s1 }
 0x176   :  { %v270_v56 = vpop.f32.mrb[2].mxu0 }
 0x177   :  { %v281_v57 = vrot.slane %v270_v56, %v191_v52  ;;  %v987_v58 = vpop.f32.mrb[3].mxu0 }
 0x179   :  { %282 = vrot.lane.b32.xlu0 %v281_v57, %s1419_s14 }
 0x17c   :  { %v359_v59 = vpop.f32.mrb[2].mxu1 }
 0x17d   :  { %v370_v60 = vrot.slane %v359_v59, %v191_v52  ;;  %v1022_v61 = vpop.f32.mrb[3].mxu1 }
 0x17f   :  { %371 = vrot.lane.b32.xlu0 %v370_v60, %s1420_s0 }
 0x196   :  { %v448_v62 = vpop.f32.mrb[4].mxu0 }
 0x197   :  { %452 = vst.msk [vmem:[#allocation2 + $0x2] sm:$0x3] %vm107_vm9, %v448_v62  ;;  %v1057_v63 = vpop.f32.mrb[5].mxu0 }
 0x19c   :  { %v525_v0 = vpop.f32.mrb[4].mxu1 }
 0x19d   :  { %v536_v1 = vrot.slane %v525_v0, %v191_v52  ;;  %v1092_v2 = vpop.f32.mrb[5].mxu1 }
 0x19f   :  { %537 = vrot.lane.b32.xlu1 %v536_v1, %s1418_s1 }
 0x1b6   :  { %v613_v3 = vpop.f32.mrb[6].mxu0 }
 0x1b7   :  { %v624_v4 = vrot.slane %v613_v3, %v191_v52  ;;  %v1127_v5 = vpop.f32.mrb[7].mxu0 }
 0x1b9   :  { %625 = vrot.lane.b32.xlu1 %v624_v4, %s1419_s14 }
 0x1bc   :  { %v701_v6 = vpop.f32.mrb[6].mxu1 }
 0x1bd   :  { %v712_v7 = vrot.slane %v701_v6, %v191_v52  ;;  %v1162_v8 = vpop.f32.mrb[7].mxu1 }
 0x1bf   :  { %713 = vrot.lane.b32.xlu1 %v712_v7, %s1420_s0 }
 0x1d1   :  { %v194_v9 = vpop.permute.xlu0 %193 }
 0x1d2   :  { %197 = vst.msk [vmem:[#allocation2] sm:$0x3] %vm196_vm10, %v194_v9 }
 0x1eb   :  { %v283_v10 = vpop.permute.xlu0 %282 }
 0x1ec   :  { %286 = vst.msk [vmem:[#allocation2] sm:$0x3] %vm285_vm11, %v283_v10 }
 0x1f1   :  { %v372_v11 = vpop.permute.xlu0 %371 }
 0x1f2   :  { %375 = vst.msk [vmem:[#allocation2] sm:$0x3] %vm374_vm12, %v372_v11 }
 0x211   :  { %v538_v12 = vpop.permute.xlu1 %537 }
 0x212   :  { %540 = vst.msk [vmem:[#allocation2 + $0x2] sm:$0x3] %vm196_vm10, %v538_v12 }
 0x22b   :  { %v626_v13 = vpop.permute.xlu1 %625 }
 0x22c   :  { %628 = vst.msk [vmem:[#allocation2 + $0x2] sm:$0x3] %vm285_vm11, %v626_v13 }
 0x231   :  { %v714_v14 = vpop.permute.xlu1 %713 }
 0x232   :  { %716 = vst.msk [vmem:[#allocation2 + $0x2] sm:$0x3] %vm374_vm12, %v714_v14 }
 0x233   :  { %1392 = shalt.err (!%p1389_p4)
}
 0x234   :  { %s1393_s20 = scalar_lea.hbm %s1694_s2, 64 }
 0x235   :  { %p1394_p5 = scmp.ne.s32.totalorder %s1694_s2, %s1393_s20  ;;  %p1397_p6 = scmp.lt.u32.totalorder %s1393_s20, %s1694_s2 }
 0x237   :  { %p1399_p7 = pnand %p1397_p6, %p1394_p5 }
 0x239   :  { %1402 = shalt.err (!%p1399_p7)
}
 0x23a   :  { %726 = dma.vmem_to_hbm [thread:$0]  %s724_s16, 64, %s1694_s2, [#allocation3]  }
 0x23b   :  { %1403 = dma.done.wait [#allocation3], 64  }
 0x23c   :  { %1404 = vsyncadd [#allocation3], 4294967232 }
 0x23d   :  { %730 = vsyncpa [#allocation3], 1 }

</bundles_post_ra>
